<compile_context>
chip_gen: v6e
topology: v6e:2x2x1
jax: 0.10.0
libtpu: 0.0.40
codegen_flags: <defaults>
</compile_context>

<pallas_src>
import jax
import jax.numpy as jnp
from jax.experimental import pallas as pl
from jax.experimental.pallas import tpu as pltpu

LANE = 128  # pad every feature width to this for lane-dense layout


def _fused_sage_kernel(a_ref, invdeg_ref, x_ref,
                       ws1_ref, wn1_ref, b1_ref,
                       ws2_ref, wn2_ref, b2_ref,
                       ws3_ref, wn3_ref, b3_ref,
                       o_ref):
    """Fused 3-layer SAGEConv('mean') forward, fully VMEM resident.

    a_ref      : (N, N)   bf16 0/1 adjacency (dst x src) -- exact in bf16
    invdeg_ref : (N, 1)   f32  1 / max(in_degree, 1)
    x_ref      : (N, P)   bf16 zero-padded input features
    ws*_ref    : (P, P)   bf16 zero-padded W_self
    wn*_ref    : (P, P)   bf16 zero-padded W_neigh
    b*_ref     : (1, P)   f32  zero-padded bias
    o_ref      : (N, P)   f32  zero-padded output features
    """
    a = a_ref[...]                      # bf16, exact 0/1 values
    inv_deg = invdeg_ref[...]           # f32 (N, 1)
    h_bf = x_ref[...]                   # bf16 carried activation (no f32 trip)

    layers = ((ws1_ref, wn1_ref, b1_ref, True),
              (ws2_ref, wn2_ref, b2_ref, True),
              (ws3_ref, wn3_ref, b3_ref, False))
    out = None
    for ws_ref, wn_ref, b_ref, relu in layers:   # static 3-iter python loop
        # Mean aggregation: exact 0/1 A on the MXU (f32 acc), f32 deg scale.
        agg = jnp.dot(a, h_bf, preferred_element_type=jnp.float32) * inv_deg
        # Self + neighbor projections: two independent MXU dots, f32 acc.
        out = (jnp.dot(h_bf, ws_ref[...], preferred_element_type=jnp.float32)
               + jnp.dot(agg.astype(jnp.bfloat16), wn_ref[...],
                         preferred_element_type=jnp.float32))
        out = out + b_ref[...]
        if relu:
            out = jnp.maximum(out, 0.0)
            h_bf = out.astype(jnp.bfloat16)   # next layer's bf16 matmul input
        # TODO(synk): Dropout(0.2) here is eval-mode identity.
    o_ref[...] = out    # final layer in f32, lane-dense store (P = 128)


def init_sage_params(key, in_size, hid_size, out_size):
    """Deterministic parameter init for the 3 SAGEConv layers."""
    sizes = [(in_size, hid_size), (hid_size, hid_size), (hid_size, out_size)]
    params = []
    for fi, fo in sizes:
        key, k1, k2, k3 = jax.random.split(key, 4)
        scale = 1.0 / jnp.sqrt(jnp.float32(fi))
        w_self = jax.random.uniform(k1, (fi, fo), jnp.float32, -scale, scale)
        w_neigh = jax.random.uniform(k2, (fi, fo), jnp.float32, -scale, scale)
        bias = jax.random.uniform(k3, (1, fo), jnp.float32, -scale, scale)
        params.append((w_self, w_neigh, bias))
    return params


def _pad_params(params, pad):
    """Zero-pad all feature axes to `pad`.

    NOTE: correctness of the padded columns relies on BOTH weights and biases
    being zero-padded; activations are zero-padded too, so garbage never leaks
    into the [:, out_size:] columns that the wrapper slices away.
    """
    packed = []
    for w_self, w_neigh, bias in params:
        fi, fo = w_self.shape
        ws = jnp.zeros((pad, pad), jnp.bfloat16).at[:fi, :fo].set(
            w_self.astype(jnp.bfloat16))
        wn = jnp.zeros((pad, pad), jnp.bfloat16).at[:fi, :fo].set(
            w_neigh.astype(jnp.bfloat16))
        b = jnp.zeros((1, pad), jnp.float32).at[:, :fo].set(bias)
        packed.append((ws, wn, b))
    return packed


def sage_forward(adj01, x, params, *, pad=LANE):
    """Mirrors SAGE.forward: 3 SAGEConv('mean') layers, ReLU between.

    Per layer: out = H @ W_self + ((A01 @ H) * inv_deg) @ W_neigh + bias.
    Dropout(0.2) treated as eval-mode identity.
    """
    n = adj01.shape[0]
    in_size = x.shape[1]
    out_size = params[-1][0].shape[1]
    assert in_size <= pad and out_size <= pad
    for w_self, _, _ in params:
        assert max(w_self.shape) <= pad

    # Exact 0/1 adjacency in bf16; 1/deg stays f32 (applied post-aggregation).
    a_bf = adj01.astype(jnp.bfloat16)
    inv_deg = (1.0 / jnp.maximum(adj01.sum(axis=1, keepdims=True), 1.0)
               ).astype(jnp.float32)
    x_p = jnp.zeros((n, pad), jnp.bfloat16).at[:, :in_size].set(
        x.astype(jnp.bfloat16))
    (ws1, wn1, b1), (ws2, wn2, b2), (ws3, wn3, b3) = _pad_params(params, pad)

    # Advisory cost: per layer 2*N^2*P (agg) + 2 * 2*N*P*P (two projections).
    flops = 3 * (2 * n * n * pad + 2 * 2 * n * pad * pad)
    bytes_accessed = (n * n * 2 + n * 4 + n * pad * 2        # A, inv_deg, X
                      + 3 * (2 * pad * pad * 2 + pad * 4)    # weights + bias
                      + n * pad * 4)                          # output (f32)

    # Single grid step, single-buffered whole-array blocks -> resident set is
    # roughly bytes_accessed. Size the scoped VMEM limit with headroom so
    # larger N doesn't trip the 16/32 MiB default. Fully-resident ceiling is
    # ~4-5k rows on v7x (64 MiB VMEM) and ~7-8k on v5e/v6e (128 MiB).
    vmem_limit = int(min(100 << 20, max(2 * bytes_accessed, 32 << 20)))

    vmem = pltpu.MemorySpace.VMEM

    def full(shape):
        return pl.BlockSpec(shape, lambda: (0, 0), memory_space=vmem)

    out_padded = pl.pallas_call(
        _fused_sage_kernel,
        out_shape=jax.ShapeDtypeStruct((n, pad), jnp.float32),
        in_specs=[
            full((n, n)), full((n, 1)), full((n, pad)),
            full((pad, pad)), full((pad, pad)), full((1, pad)),
            full((pad, pad)), full((pad, pad)), full((1, pad)),
            full((pad, pad)), full((pad, pad)), full((1, pad)),
        ],
        out_specs=full((n, pad)),
        compiler_params=pltpu.CompilerParams(vmem_limit_bytes=vmem_limit),
        cost_estimate=pl.CostEstimate(
            flops=flops, transcendentals=0, bytes_accessed=bytes_accessed),
    )(a_bf, inv_deg, x_p, ws1, wn1, b1, ws2, wn2, b2, ws3, wn3, b3)

    return out_padded[:, :out_size]


def sage_ref(a_norm, x, params):
    """Pure-JAX f32 reference (DGL SAGEConv 'mean' semantics)."""
    h = x
    for l, (w_self, w_neigh, bias) in enumerate(params):
        agg = a_norm @ h
        h = h @ w_self + agg @ w_neigh + bias
        if l != len(params) - 1:
            h = jax.nn.relu(h)
    return h


if __name__ == "__main__":
    key = jax.random.PRNGKey(0)
    N, in_size, hid_size, out_size = 16, 32, 32, 8

    k_adj, k_feat, k_param = jax.random.split(key, 3)

    # deterministic synthetic graph: dense 0/1 adjacency (mean over in-nbrs)
    adj01 = (jax.random.uniform(k_adj, (N, N)) < 0.3).astype(jnp.float32)
    x = jax.random.normal(k_feat, (N, in_size), dtype=jnp.float32)
    params = init_sage_params(k_param, in_size, hid_size, out_size)

    out = jax.jit(sage_forward)(adj01, x, params)
    out = jax.block_until_ready(out)
    assert out.shape == (N, out_size)
    assert bool(jnp.all(jnp.isfinite(out)))

    # correctness vs. f32 reference (bf16 matmul inputs over 3 layers)
    deg = jnp.maximum(adj01.sum(axis=1, keepdims=True), 1.0)
    a_norm = adj01 / deg
    ref = sage_ref(a_norm, x, params)
    max_err = float(jnp.max(jnp.abs(out - ref)))
    assert max_err < 1e-1, f"max abs err {max_err}"

    print("KERNEL_OK")
</pallas_src>

<mosaic_0001>
module attributes {stable_mosaic.version = 11 : i64} {
  func.func @_fused_sage_kernel(%arg0: memref<16x16xbf16, #tpu.memory_space<vmem>>, %arg1: memref<16x1xf32, #tpu.memory_space<vmem>>, %arg2: memref<16x128xbf16, #tpu.memory_space<vmem>>, %arg3: memref<128x128xbf16, #tpu.memory_space<vmem>>, %arg4: memref<128x128xbf16, #tpu.memory_space<vmem>>, %arg5: memref<1x128xf32, #tpu.memory_space<vmem>>, %arg6: memref<128x128xbf16, #tpu.memory_space<vmem>>, %arg7: memref<128x128xbf16, #tpu.memory_space<vmem>>, %arg8: memref<1x128xf32, #tpu.memory_space<vmem>>, %arg9: memref<128x128xbf16, #tpu.memory_space<vmem>>, %arg10: memref<128x128xbf16, #tpu.memory_space<vmem>>, %arg11: memref<1x128xf32, #tpu.memory_space<vmem>>, %arg12: memref<16x128xf32, #tpu.memory_space<vmem>>) attributes {dimension_semantics = [], scalar_prefetch = 0 : i64, scratch_operands = 0 : i64, tpu.core_type = #tpu.core_type<tc>} {
    %c0 = arith.constant 0 : index
    %c0_0 = arith.constant 0 : index
    %0 = vector.load %arg0[%c0, %c0_0] : memref<16x16xbf16, #tpu.memory_space<vmem>>, vector<16x16xbf16>
    %c0_1 = arith.constant 0 : index
    %c0_2 = arith.constant 0 : index
    %1 = vector.load %arg1[%c0_1, %c0_2] : memref<16x1xf32, #tpu.memory_space<vmem>>, vector<16x1xf32>
    %c0_3 = arith.constant 0 : index
    %c0_4 = arith.constant 0 : index
    %2 = vector.load %arg2[%c0_3, %c0_4] : memref<16x128xbf16, #tpu.memory_space<vmem>>, vector<16x128xbf16>
    %cst = arith.constant dense<0.000000e+00> : vector<16x128xf32>
    %3 = tpu.matmul %0, %2, %cst {dimension_numbers = #tpu.dot_dimension_numbers<[1], [0], [0], [1], [0, 0, 1, 1], [], []>} : vector<16x16xbf16>, vector<16x128xbf16>, vector<16x128xf32> -> vector<16x128xf32>
    %4 = vector.broadcast %1 : vector<16x1xf32> to vector<16x128xf32>
    %5 = arith.mulf %3, %4 : vector<16x128xf32>
    %c0_5 = arith.constant 0 : index
    %c0_6 = arith.constant 0 : index
    %6 = vector.load %arg3[%c0_5, %c0_6] : memref<128x128xbf16, #tpu.memory_space<vmem>>, vector<128x128xbf16>
    %cst_7 = arith.constant dense<0.000000e+00> : vector<16x128xf32>
    %7 = tpu.matmul %2, %6, %cst_7 {dimension_numbers = #tpu.dot_dimension_numbers<[1], [0], [0], [1], [0, 0, 1, 1], [], []>} : vector<16x128xbf16>, vector<128x128xbf16>, vector<16x128xf32> -> vector<16x128xf32>
    %8 = arith.truncf %5 : vector<16x128xf32> to vector<16x128xbf16>
    %c0_8 = arith.constant 0 : index
    %c0_9 = arith.constant 0 : index
    %9 = vector.load %arg4[%c0_8, %c0_9] : memref<128x128xbf16, #tpu.memory_space<vmem>>, vector<128x128xbf16>
    %cst_10 = arith.constant dense<0.000000e+00> : vector<16x128xf32>
    %10 = tpu.matmul %8, %9, %cst_10 {dimension_numbers = #tpu.dot_dimension_numbers<[1], [0], [0], [1], [0, 0, 1, 1], [], []>} : vector<16x128xbf16>, vector<128x128xbf16>, vector<16x128xf32> -> vector<16x128xf32>
    %11 = arith.addf %7, %10 : vector<16x128xf32>
    %c0_11 = arith.constant 0 : index
    %c0_12 = arith.constant 0 : index
    %12 = vector.load %arg5[%c0_11, %c0_12] : memref<1x128xf32, #tpu.memory_space<vmem>>, vector<1x128xf32>
    %13 = vector.broadcast %12 : vector<1x128xf32> to vector<16x128xf32>
    %14 = arith.addf %11, %13 : vector<16x128xf32>
    %cst_13 = arith.constant 0.000000e+00 : f32
    %15 = vector.broadcast %cst_13 : f32 to vector<16x128xf32>
    %16 = arith.maximumf %14, %15 : vector<16x128xf32>
    %17 = arith.truncf %16 : vector<16x128xf32> to vector<16x128xbf16>
    %cst_14 = arith.constant dense<0.000000e+00> : vector<16x128xf32>
    %18 = tpu.matmul %0, %17, %cst_14 {dimension_numbers = #tpu.dot_dimension_numbers<[1], [0], [0], [1], [0, 0, 1, 1], [], []>} : vector<16x16xbf16>, vector<16x128xbf16>, vector<16x128xf32> -> vector<16x128xf32>
    %19 = vector.broadcast %1 : vector<16x1xf32> to vector<16x128xf32>
    %20 = arith.mulf %18, %19 : vector<16x128xf32>
    %c0_15 = arith.constant 0 : index
    %c0_16 = arith.constant 0 : index
    %21 = vector.load %arg6[%c0_15, %c0_16] : memref<128x128xbf16, #tpu.memory_space<vmem>>, vector<128x128xbf16>
    %cst_17 = arith.constant dense<0.000000e+00> : vector<16x128xf32>
    %22 = tpu.matmul %17, %21, %cst_17 {dimension_numbers = #tpu.dot_dimension_numbers<[1], [0], [0], [1], [0, 0, 1, 1], [], []>} : vector<16x128xbf16>, vector<128x128xbf16>, vector<16x128xf32> -> vector<16x128xf32>
    %23 = arith.truncf %20 : vector<16x128xf32> to vector<16x128xbf16>
    %c0_18 = arith.constant 0 : index
    %c0_19 = arith.constant 0 : index
    %24 = vector.load %arg7[%c0_18, %c0_19] : memref<128x128xbf16, #tpu.memory_space<vmem>>, vector<128x128xbf16>
    %cst_20 = arith.constant dense<0.000000e+00> : vector<16x128xf32>
    %25 = tpu.matmul %23, %24, %cst_20 {dimension_numbers = #tpu.dot_dimension_numbers<[1], [0], [0], [1], [0, 0, 1, 1], [], []>} : vector<16x128xbf16>, vector<128x128xbf16>, vector<16x128xf32> -> vector<16x128xf32>
    %26 = arith.addf %22, %25 : vector<16x128xf32>
    %c0_21 = arith.constant 0 : index
    %c0_22 = arith.constant 0 : index
    %27 = vector.load %arg8[%c0_21, %c0_22] : memref<1x128xf32, #tpu.memory_space<vmem>>, vector<1x128xf32>
    %28 = vector.broadcast %27 : vector<1x128xf32> to vector<16x128xf32>
    %29 = arith.addf %26, %28 : vector<16x128xf32>
    %cst_23 = arith.constant 0.000000e+00 : f32
    %30 = vector.broadcast %cst_23 : f32 to vector<16x128xf32>
    %31 = arith.maximumf %29, %30 : vector<16x128xf32>
    %32 = arith.truncf %31 : vector<16x128xf32> to vector<16x128xbf16>
    %cst_24 = arith.constant dense<0.000000e+00> : vector<16x128xf32>
    %33 = tpu.matmul %0, %32, %cst_24 {dimension_numbers = #tpu.dot_dimension_numbers<[1], [0], [0], [1], [0, 0, 1, 1], [], []>} : vector<16x16xbf16>, vector<16x128xbf16>, vector<16x128xf32> -> vector<16x128xf32>
    %34 = vector.broadcast %1 : vector<16x1xf32> to vector<16x128xf32>
    %35 = arith.mulf %33, %34 : vector<16x128xf32>
    %c0_25 = arith.constant 0 : index
    %c0_26 = arith.constant 0 : index
    %36 = vector.load %arg9[%c0_25, %c0_26] : memref<128x128xbf16, #tpu.memory_space<vmem>>, vector<128x128xbf16>
    %cst_27 = arith.constant dense<0.000000e+00> : vector<16x128xf32>
    %37 = tpu.matmul %32, %36, %cst_27 {dimension_numbers = #tpu.dot_dimension_numbers<[1], [0], [0], [1], [0, 0, 1, 1], [], []>} : vector<16x128xbf16>, vector<128x128xbf16>, vector<16x128xf32> -> vector<16x128xf32>
    %38 = arith.truncf %35 : vector<16x128xf32> to vector<16x128xbf16>
    %c0_28 = arith.constant 0 : index
    %c0_29 = arith.constant 0 : index
    %39 = vector.load %arg10[%c0_28, %c0_29] : memref<128x128xbf16, #tpu.memory_space<vmem>>, vector<128x128xbf16>
    %cst_30 = arith.constant dense<0.000000e+00> : vector<16x128xf32>
    %40 = tpu.matmul %38, %39, %cst_30 {dimension_numbers = #tpu.dot_dimension_numbers<[1], [0], [0], [1], [0, 0, 1, 1], [], []>} : vector<16x128xbf16>, vector<128x128xbf16>, vector<16x128xf32> -> vector<16x128xf32>
    %41 = arith.addf %37, %40 : vector<16x128xf32>
    %c0_31 = arith.constant 0 : index
    %c0_32 = arith.constant 0 : index
    %42 = vector.load %arg11[%c0_31, %c0_32] : memref<1x128xf32, #tpu.memory_space<vmem>>, vector<1x128xf32>
    %43 = vector.broadcast %42 : vector<1x128xf32> to vector<16x128xf32>
    %44 = arith.addf %41, %43 : vector<16x128xf32>
    %c0_33 = arith.constant 0 : index
    %c0_34 = arith.constant 0 : index
    %45 = vector.load %arg12[%c0_33, %c0_34] : memref<16x128xf32, #tpu.memory_space<vmem>>, vector<16x128xf32>
    tpu.vector_store %arg12[%c0_33, %c0_34], %44 {strides = array<i32>} : memref<16x128xf32, #tpu.memory_space<vmem>>, vector<16x128xf32>,
    return
  }
}

</mosaic_0001>

<bundles_post_ra>
// kernel: sage_forward.1
= control target key start
LH: loop header
LB: loop body
LE: loop exit
PB: predicated region body
PF: predicated region fallthrough
CT: control target
= control target key end

     0   :  { %v1182_v0 = vmov 0.0   ;;  %vm1183_vm0 = vmmov 0   ;;  %v1184_v3 = vmov 0   ;;  %vm59_vm1 = vcmask 130048   ;;  %s1508_s2 = inlined_call_operand.vmem [shape: bf16[16,128], index: 2, kind: input, shape index: {}]   ;;  %s1509_s0 = inlined_call_operand.vmem [shape: bf16[16,16], index: 0, kind: input, shape index: {}]   ;;  %s1510_s1 = inlined_call_operand.vmem [shape: f32[16,1], index: 1, kind: input, shape index: {}]   ;;  %s1511_s3 = inlined_call_operand.vmem [shape: bf16[128,128], index: 3, kind: input, shape index: {}]   ;;  %s1512_s4 = inlined_call_operand.vmem [shape: bf16[128,128], index: 4, kind: input, shape index: {}]   ;;  %s1513_s6 = inlined_call_operand.vmem [shape: bf16[128,128], index: 6, kind: input, shape index: {}]   ;;  %s1514_s7 = inlined_call_operand.vmem [shape: bf16[128,128], index: 7, kind: input, shape index: {}]   ;;  %s1515_s5 = inlined_call_operand.vmem [shape: f32[1,128], index: 5, kind: input, shape index: {}]   ;;  %s1516_s9 = inlined_call_operand.vmem [shape: bf16[128,128], index: 9, kind: input, shape index: {}]   ;;  %s1517_s10 = inlined_call_operand.vmem [shape: bf16[128,128], index: 10, kind: input, shape index: {}]   ;;  %s1518_s8 = inlined_call_operand.vmem [shape: f32[1,128], index: 8, kind: input, shape index: {}]   ;;  %s1519_s11 = inlined_call_operand.vmem [shape: f32[1,128], index: 11, kind: input, shape index: {}]   ;;  %s1520_s12 = inlined_call_operand.vmem [shape: f32[16,128], index: 12, kind: output, shape index: {}]  }
   0x1   :  { %990 = vmatprep.subr.bf16.mxu0 %v1182_v0  ;;  %v1132_v1 = vld [vmem:[%s1508_s2] sm:$0xff]   ;;  %992 = vmatprep.mubr.msk.bf16.mxu0 %vm1183_vm0, %v1182_v0  ;;  %v1134_v5 = vld [vmem:[%s1511_s3 + $0x38] sm:$0xff]   ;;  %v45_v6 = vld [vmem:[%s1510_s1 + $0x8] sm:$0xff] }
   0x2   :  { %v1259_v2 = vld [vmem:[%s1509_s0] sm:$0xff]   ;;  %1131 = vset.pattern.permute.xlu0 %v1184_v3  ;;  %996 = vmatprep.subr.bf16.mxu1 %v1182_v0  ;;  %v1136_v7 = vld [vmem:[%s1512_s4 + $0x38] sm:$0xff]   ;;  %v1135_v8 = vld [vmem:[%s1511_s3 + $0x30] sm:$0xff]  }
   0x3   :  { %991 = vmatpush3.bf16.msra.mxu0 %v1132_v1  ;;  %v44_v4 = vld [vmem:[%s1510_s1] sm:$0xff]  ;;  %1012 = vmatprep.mubr.msk.bf16.mxu1 %vm1183_vm0, %v1182_v0  ;;  %v1138_v9 = vld [vmem:[%s1512_s4 + $0x30] sm:$0xff]   ;;  %v1137_v10 = vld [vmem:[%s1511_s3 + $0x28] sm:$0xff]  }
   0x4   :  { %106 = vperm.xlu0 %1131, %v44_v4   ;;  %1016 = vmatprep.subr.bf16.mxu0 %v1182_v0  ;;  %v1140_v11 = vld [vmem:[%s1512_s4 + $0x28] sm:$0xff]   ;;  %v1139_v12 = vld [vmem:[%s1511_s3 + $0x20] sm:$0xff]   ;;  %v1141_v14 = vld [vmem:[%s1511_s3 + $0x18] sm:$0xff]  }
   0x5   :  { %997 = vmatpush3.bf16.msra.mxu1 %v1136_v7  ;;  %v1142_v13 = vld [vmem:[%s1512_s4 + $0x20] sm:$0xff]   ;;  %v1144_v15 = vld [vmem:[%s1512_s4 + $0x18] sm:$0xff]   ;;  %v1143_v16 = vld [vmem:[%s1511_s3 + $0x10] sm:$0xff]  }
   0x6   :  { %993 = vmatmul.mubr.msk.bf16.vlgmr.msra.gmra.mxu0 %vm59_vm1, %v1259_v2  ;;  %998 = vmatprep.subr.bf16.mxu1 %v1182_v0  ;;  %v1146_v17 = vld [vmem:[%s1512_s4 + $0x10] sm:$0xff]   ;;  %v1145_v18 = vld [vmem:[%s1511_s3 + $0x8] sm:$0xff]   ;;  %v1147_v19 = vld [vmem:[%s1511_s3] sm:$0xff]  }
   0x7   :  { %1017 = vmatpush3.bf16.msra.mxu0 %v1134_v5  ;;  %1032 = vmatprep.mubr.msk.bf16.mxu0 %vm1183_vm0, %v1182_v0  ;;  %v1148_v20 = vld [vmem:[%s1512_s4 + $0x8] sm:$0xff]   ;;  %v1149_v21 = vld [vmem:[%s1512_s4] sm:$0xff]   ;;  %v1158_v35 = vld [vmem:[%s1514_s7 + $0x38] sm:$0xff]  }
   0x8   :  { %111 = vperm.xlu0 %1131, %v45_v6   ;;  %1018 = vmatprep.subr.bf16.mxu0 %v1182_v0  ;;  %v1159_v36 = vld [vmem:[%s1514_s7 + $0x30] sm:$0xff]   ;;  %v1160_v37 = vld [vmem:[%s1514_s7 + $0x28] sm:$0xff]   ;;  %v1161_v38 = vld [vmem:[%s1514_s7 + $0x20] sm:$0xff]  }
   0x9   :  { %999 = vmatpush3.bf16.msra.mxu1 %v1138_v9  ;;  %v1162_v39 = vld [vmem:[%s1514_s7 + $0x18] sm:$0xff]   ;;  %v1163_v40 = vld [vmem:[%s1514_s7 + $0x10] sm:$0xff]   ;;  %v893_v43 = vld [vmem:[%s1515_s5] ss:$0 sm:$0xff] }
   0xa   :  { %1000 = vmatprep.subr.bf16.mxu1 %v1182_v0  ;;  %v1150_v53 = vld [vmem:[%s1513_s6 + $0x38] sm:$0xff]   ;;  %v1151_v54 = vld [vmem:[%s1513_s6 + $0x30] sm:$0xff]   ;;  %v1152_v55 = vld [vmem:[%s1513_s6 + $0x28] sm:$0xff]  }
   0xb   :  { %1019 = vmatpush3.bf16.msra.mxu0 %v1135_v8  ;;  %v1153_v56 = vld [vmem:[%s1513_s6 + $0x20] sm:$0xff]   ;;  %v1154_v57 = vld [vmem:[%s1513_s6 + $0x18] sm:$0xff]   ;;  %v1155_v58 = vld [vmem:[%s1513_s6 + $0x10] sm:$0xff]  }
   0xc   :  { %1020 = vmatprep.subr.bf16.mxu0 %v1182_v0  ;;  %v1156_v59 = vld [vmem:[%s1513_s6 + $0x8] sm:$0xff]   ;;  %v1157_v60 = vld [vmem:[%s1513_s6] sm:$0xff]  }
   0xd   :  { %1001 = vmatpush3.bf16.msra.mxu1 %v1140_v11  ;;  %v1164_v61 = vld [vmem:[%s1514_s7 + $0x8] sm:$0xff]   ;;  %v1165_v62 = vld [vmem:[%s1514_s7] sm:$0xff]  }
   0xe   :  { %1002 = vmatprep.subr.bf16.mxu1 %v1182_v0 }
   0xf   :  { %1021 = vmatpush3.bf16.msra.mxu0 %v1137_v10 }
  0x10   :  { %1022 = vmatprep.subr.bf16.mxu0 %v1182_v0 }
  0x11   :  { %1003 = vmatpush3.bf16.msra.mxu1 %v1142_v13  ;;  %v1175_v13 = vld [vmem:[%s1517_s10 + $0x30] sm:$0xff]  }
  0x12   :  { %1004 = vmatprep.subr.bf16.mxu1 %v1182_v0 }
  0x13   :  { %1023 = vmatpush3.bf16.msra.mxu0 %v1139_v12  ;;  %v1174_v12 = vld [vmem:[%s1517_s10 + $0x38] sm:$0xff]  }
  0x14   :  { %1024 = vmatprep.subr.bf16.mxu0 %v1182_v0 }
  0x15   :  { %1005 = vmatpush3.bf16.msra.mxu1 %v1144_v15  ;;  %v1177_v15 = vld [vmem:[%s1517_s10 + $0x20] sm:$0xff]  }
  0x16   :  { %1006 = vmatprep.subr.bf16.mxu1 %v1182_v0 }
  0x17   :  { %1025 = vmatpush3.bf16.msra.mxu0 %v1141_v14  ;;  %v1176_v14 = vld [vmem:[%s1517_s10 + $0x28] sm:$0xff]  }
  0x18   :  { %1026 = vmatprep.subr.bf16.mxu0 %v1182_v0 }
  0x19   :  { %1007 = vmatpush3.bf16.msra.mxu1 %v1146_v17  ;;  %v1179_v17 = vld [vmem:[%s1517_s10 + $0x10] sm:$0xff]  }
  0x1a   :  { %1008 = vmatprep.subr.bf16.mxu1 %v1182_v0 }
  0x1b   :  { %1027 = vmatpush3.bf16.msra.mxu0 %v1143_v16  ;;  %v1178_v16 = vld [vmem:[%s1517_s10 + $0x18] sm:$0xff]  }
  0x1c   :  { %1028 = vmatprep.subr.bf16.mxu0 %v1182_v0 }
  0x1d   :  { %1009 = vmatpush3.bf16.msra.mxu1 %v1148_v20  ;;  %v911_v20 = vld [vmem:[%s1518_s8] ss:$0 sm:$0xff] }
  0x1e   :  { %1010 = vmatprep.subr.bf16.mxu1 %v1182_v0 }
  0x1f   :  { %1029 = vmatpush3.bf16.msra.mxu0 %v1145_v18 }
  0x20   :  { %1030 = vmatprep.subr.bf16.mxu0 %v1182_v0 }
  0x21   :  { %1011 = vmatpush3.bf16.msra.mxu1 %v1149_v21 }
  0x22   :  { %1036 = vmatprep.subr.bf16.mxu1 %v1182_v0 }
  0x23   :  { %1031 = vmatpush3.bf16.msra.mxu0 %v1147_v19 }
  0x24   :  { %1042 = vmatprep.subr.bf16.mxu0 %v1182_v0 }
  0x26   :  { %1033 = vmatmul.mubr.bf16.vlgmr.msra.gmra.mxu0 %v1132_v1 }
  0x27   :  { %1058 = vmatprep.mubr.msk.bf16.mxu0 %vm1183_vm0, %v1182_v0  ;;  %1043 = vmatpush3.bf16.msra.mxu0 %v1158_v35  ;;  %v1170_v35 = vld [vmem:[%s1516_s9 + $0x18] sm:$0xff]  }
  0x28   :  { %1044 = vmatprep.subr.bf16.mxu0 %v1182_v0 }
  0x2b   :  { %1045 = vmatpush3.bf16.msra.mxu0 %v1159_v36  ;;  %v1171_v36 = vld [vmem:[%s1516_s9 + $0x10] sm:$0xff]  }
  0x2c   :  { %1046 = vmatprep.subr.bf16.mxu0 %v1182_v0 }
  0x2f   :  { %1047 = vmatpush3.bf16.msra.mxu0 %v1160_v37  ;;  %v1172_v37 = vld [vmem:[%s1516_s9 + $0x8] sm:$0xff]  }
  0x30   :  { %1048 = vmatprep.subr.bf16.mxu0 %v1182_v0 }
  0x33   :  { %1049 = vmatpush3.bf16.msra.mxu0 %v1161_v38  ;;  %v1173_v38 = vld [vmem:[%s1516_s9] sm:$0xff]  }
  0x34   :  { %1050 = vmatprep.subr.bf16.mxu0 %v1182_v0 }
  0x37   :  { %1051 = vmatpush3.bf16.msra.mxu0 %v1162_v39  ;;  %v1180_v39 = vld [vmem:[%s1517_s10 + $0x8] sm:$0xff]  }
  0x38   :  { %1052 = vmatprep.subr.bf16.mxu0 %v1182_v0 }
  0x3b   :  { %1053 = vmatpush3.bf16.msra.mxu0 %v1163_v40  ;;  %v1181_v40 = vld [vmem:[%s1517_s10] sm:$0xff]  }
  0x3c   :  { %1054 = vmatprep.subr.bf16.mxu0 %v1182_v0 }
  0x3f   :  { %1055 = vmatpush3.bf16.msra.mxu0 %v1164_v61 }
  0x40   :  { %1056 = vmatprep.subr.bf16.mxu0 %v1182_v0 }
  0x43   :  { %1057 = vmatpush3.bf16.msra.mxu0 %v1165_v62 }
  0x44   :  { %1082 = vmatprep.subr.bf16.mxu0 %v1182_v0 }
  0x7f   :  { %v1341_v22 = vpop.permute.xlu0 %106 }
  0x83   :  { %v1343_v25 = vpop.permute.xlu0 %111 }
  0xc6   :  { %v97_v23 = vpop.f32.mrf.mxu0 }
  0xc7   :  { %v114_v27 = vmul.f32 %v1341_v22, %v97_v23 }
  0xc8   :  { %v994_v24 = vpop.f32.mrf.mxu0 }
  0xca   :  { %v100_v26 = vpop.f32.mrf.mxu0 }
  0xcb   :  { %v115_v28 = vmul.f32 %v1343_v25, %v100_v26 }
  0xcc   :  { %v995_v29 = vpop.f32.mrf.mxu0 }
  0xcd   :  { %v132_v30 = vpack.c.bf16 %v115_v28, %v114_v27 }
  0xcf   :  { %1013 = vmatmul.mubr.bf16.vlgmr.msra.gmra.mxu1 %v132_v30 }
  0xd0   :  { %1038 = vmatprep.mubr.msk.bf16.mxu1 %vm1183_vm0, %v1182_v0 }
  0xe6   :  { %v320_v31 = vpop.f32.mrf.mxu0 }
  0xe8   :  { %v1034_v32 = vpop.f32.mrf.mxu0 }
  0xe9   :  { %v1166_v32 = vld [vmem:[%s1516_s9 + $0x38] sm:$0xff]  }
  0xea   :  { %v323_v33 = vpop.f32.mrf.mxu0 }
  0xec   :  { %v1035_v34 = vpop.f32.mrf.mxu0 }
  0xed   :  { %v1168_v34 = vld [vmem:[%s1516_s9 + $0x28] sm:$0xff]  }
 0x18f   :  { %v231_v41 = vpop.f32.mrf.mxu1 }
 0x190   :  { %v321_v42 = vadd.f32 %v320_v31, %v231_v41 }
 0x191   :  { %v1014_v44 = vpop.f32.mrf.mxu1 }
 0x192   :  { %v334_v46 = vadd.f32 %v893_v43, %v321_v42 }
 0x193   :  { %v234_v45 = vpop.f32.mrf.mxu1 }
 0x194   :  { %v324_v47 = vadd.f32 %v323_v33, %v234_v45  ;;  %v336_v50 = vmax.f32 %v334_v46, 0.0  ;;  %v1167_v33 = vld [vmem:[%s1516_s9 + $0x30] sm:$0xff]  }
 0x195   :  { %v1015_v48 = vpop.f32.mrf.mxu1 }
 0x196   :  { %v335_v49 = vadd.f32 %v893_v43, %v324_v47 }
 0x198   :  { %v337_v51 = vmax.f32 %v335_v49, 0.0 }
 0x19a   :  { %v338_v52 = vpack.c.bf16 %v337_v51, %v336_v50 }
 0x19c   :  { %1037 = vmatpush3.bf16.msra.mxu1 %v338_v52 }
 0x19d   :  { %1062 = vmatprep.subr.bf16.mxu1 %v1182_v0 }
 0x19f   :  { %1039 = vmatmul.mubr.msk.bf16.vlgmr.msra.gmra.mxu1 %vm59_vm1, %v1259_v2 }
 0x1a0   :  { %1063 = vmatpush3.bf16.msra.mxu1 %v1150_v53  ;;  %1078 = vmatprep.mubr.msk.bf16.mxu1 %vm1183_vm0, %v1182_v0 }
 0x1a1   :  { %1064 = vmatprep.subr.bf16.mxu1 %v1182_v0 }
 0x1a4   :  { %1065 = vmatpush3.bf16.msra.mxu1 %v1151_v54 }
 0x1a5   :  { %1066 = vmatprep.subr.bf16.mxu1 %v1182_v0 }
 0x1a8   :  { %1067 = vmatpush3.bf16.msra.mxu1 %v1152_v55 }
 0x1a9   :  { %1068 = vmatprep.subr.bf16.mxu1 %v1182_v0 }
 0x1ac   :  { %1069 = vmatpush3.bf16.msra.mxu1 %v1153_v56 }
 0x1ad   :  { %1070 = vmatprep.subr.bf16.mxu1 %v1182_v0 }
 0x1b0   :  { %1071 = vmatpush3.bf16.msra.mxu1 %v1154_v57 }
 0x1b1   :  { %1072 = vmatprep.subr.bf16.mxu1 %v1182_v0 }
 0x1b4   :  { %1073 = vmatpush3.bf16.msra.mxu1 %v1155_v58 }
 0x1b5   :  { %1074 = vmatprep.subr.bf16.mxu1 %v1182_v0 }
 0x1b8   :  { %1075 = vmatpush3.bf16.msra.mxu1 %v1156_v59 }
 0x1b9   :  { %1076 = vmatprep.subr.bf16.mxu1 %v1182_v0 }
 0x1bc   :  { %1077 = vmatpush3.bf16.msra.mxu1 %v1157_v60 }
 0x1bd   :  { %1088 = vmatprep.subr.bf16.mxu1 %v1182_v0 }
 0x1bf   :  { %1079 = vmatmul.mubr.bf16.vlgmr.msra.gmra.mxu1 %v338_v52  ;;  %v929_v52 = vld [vmem:[%s1519_s11] ss:$0 sm:$0xff] }
 0x1c0   :  { %1104 = vmatprep.mubr.msk.bf16.mxu1 %vm1183_vm0, %v1182_v0  ;;  %1089 = vmatpush3.bf16.msra.mxu1 %v1174_v12 }
 0x1c1   :  { %1090 = vmatprep.subr.bf16.mxu1 %v1182_v0 }
 0x1c4   :  { %1091 = vmatpush3.bf16.msra.mxu1 %v1175_v13 }
 0x1c5   :  { %1092 = vmatprep.subr.bf16.mxu1 %v1182_v0 }
 0x1c8   :  { %1093 = vmatpush3.bf16.msra.mxu1 %v1176_v14 }
 0x1c9   :  { %1094 = vmatprep.subr.bf16.mxu1 %v1182_v0 }
 0x1cc   :  { %1095 = vmatpush3.bf16.msra.mxu1 %v1177_v15 }
 0x1cd   :  { %1096 = vmatprep.subr.bf16.mxu1 %v1182_v0 }
 0x1d0   :  { %1097 = vmatpush3.bf16.msra.mxu1 %v1178_v16 }
 0x1d1   :  { %1098 = vmatprep.subr.bf16.mxu1 %v1182_v0 }
 0x1d4   :  { %1099 = vmatpush3.bf16.msra.mxu1 %v1179_v17 }
 0x1d5   :  { %1100 = vmatprep.subr.bf16.mxu1 %v1182_v0 }
 0x1d8   :  { %1101 = vmatpush3.bf16.msra.mxu1 %v1180_v39 }
 0x1d9   :  { %1102 = vmatprep.subr.bf16.mxu1 %v1182_v0 }
 0x1dc   :  { %1103 = vmatpush3.bf16.msra.mxu1 %v1181_v40 }
 0x25f   :  { %v373_v63 = vpop.f32.mrf.mxu1 }
 0x260   :  { %v380_v4 = vmul.f32 %v373_v63, %v1341_v22 }
 0x261   :  { %v1040_v1 = vpop.f32.mrf.mxu1 }
 0x263   :  { %v376_v3 = vpop.f32.mrf.mxu1 }
 0x264   :  { %v381_v5 = vmul.f32 %v376_v3, %v1343_v25 }
 0x265   :  { %v1041_v6 = vpop.f32.mrf.mxu1 }
 0x266   :  { %v398_v7 = vpack.c.bf16 %v381_v5, %v380_v4 }
 0x268   :  { %1059 = vmatmul.mubr.bf16.vlgmr.msra.gmra.mxu0 %v398_v7 }
 0x269   :  { %1084 = vmatprep.mubr.msk.bf16.mxu0 %vm1183_vm0, %v1182_v0 }
 0x27f   :  { %v586_v8 = vpop.f32.mrf.mxu1 }
 0x281   :  { %v1080_v9 = vpop.f32.mrf.mxu1 }
 0x283   :  { %v589_v10 = vpop.f32.mrf.mxu1 }
 0x285   :  { %v1081_v11 = vpop.f32.mrf.mxu1 }
 0x328   :  { %v497_v18 = vpop.f32.mrf.mxu0 }
 0x329   :  { %v587_v19 = vadd.f32 %v586_v8, %v497_v18 }
 0x32a   :  { %v1060_v21 = vpop.f32.mrf.mxu0 }
 0x32b   :  { %v600_v24 = vadd.f32 %v911_v20, %v587_v19 }
 0x32c   :  { %v500_v23 = vpop.f32.mrf.mxu0 }
 0x32d   :  { %v590_v26 = vadd.f32 %v589_v10, %v500_v23  ;;  %v602_v29 = vmax.f32 %v600_v24, 0.0 }
 0x32e   :  { %v1061_v27 = vpop.f32.mrf.mxu0 }
 0x32f   :  { %v601_v28 = vadd.f32 %v911_v20, %v590_v26 }
 0x331   :  { %v603_v30 = vmax.f32 %v601_v28, 0.0 }
 0x333   :  { %v604_v31 = vpack.c.bf16 %v603_v30, %v602_v29 }
 0x335   :  { %1083 = vmatpush3.bf16.msra.mxu0 %v604_v31 }
 0x336   :  { %1108 = vmatprep.subr.bf16.mxu0 %v1182_v0 }
 0x338   :  { %1085 = vmatmul.mubr.msk.bf16.vlgmr.msra.gmra.mxu0 %vm59_vm1, %v1259_v2  ;;  %v1169_v2 = vld [vmem:[%s1516_s9 + $0x20] sm:$0xff]  }
 0x339   :  { %1109 = vmatpush3.bf16.msra.mxu0 %v1166_v32  ;;  %1124 = vmatprep.mubr.msk.bf16.mxu0 %vm1183_vm0, %v1182_v0 }
 0x33a   :  { %1110 = vmatprep.subr.bf16.mxu0 %v1182_v0 }
 0x33d   :  { %1111 = vmatpush3.bf16.msra.mxu0 %v1167_v33 }
 0x33e   :  { %1112 = vmatprep.subr.bf16.mxu0 %v1182_v0 }
 0x341   :  { %1113 = vmatpush3.bf16.msra.mxu0 %v1168_v34 }
 0x342   :  { %1114 = vmatprep.subr.bf16.mxu0 %v1182_v0 }
 0x345   :  { %1115 = vmatpush3.bf16.msra.mxu0 %v1169_v2 }
 0x346   :  { %1116 = vmatprep.subr.bf16.mxu0 %v1182_v0 }
 0x349   :  { %1117 = vmatpush3.bf16.msra.mxu0 %v1170_v35 }
 0x34a   :  { %1118 = vmatprep.subr.bf16.mxu0 %v1182_v0 }
 0x34d   :  { %1119 = vmatpush3.bf16.msra.mxu0 %v1171_v36 }
 0x34e   :  { %1120 = vmatprep.subr.bf16.mxu0 %v1182_v0 }
 0x351   :  { %1121 = vmatpush3.bf16.msra.mxu0 %v1172_v37 }
 0x352   :  { %1122 = vmatprep.subr.bf16.mxu0 %v1182_v0 }
 0x355   :  { %1123 = vmatpush3.bf16.msra.mxu0 %v1173_v38 }
 0x358   :  { %1125 = vmatmul.mubr.bf16.vlgmr.msra.gmra.mxu0 %v604_v31 }
 0x3f8   :  { %v639_v41 = vpop.f32.mrf.mxu0 }
 0x3f9   :  { %v646_v44 = vmul.f32 %v639_v41, %v1341_v22 }
 0x3fa   :  { %v1086_v42 = vpop.f32.mrf.mxu0 }
 0x3fc   :  { %v642_v43 = vpop.f32.mrf.mxu0 }
 0x3fd   :  { %v647_v45 = vmul.f32 %v642_v43, %v1343_v25 }
 0x3fe   :  { %v1087_v46 = vpop.f32.mrf.mxu0 }
 0x3ff   :  { %v664_v47 = vpack.c.bf16 %v647_v45, %v646_v44 }
 0x401   :  { %1105 = vmatmul.mubr.bf16.vlgmr.msra.gmra.mxu1 %v664_v47 }
 0x418   :  { %v852_v48 = vpop.f32.mrf.mxu0 }
 0x41a   :  { %v1126_v49 = vpop.f32.mrf.mxu0 }
 0x41c   :  { %v855_v50 = vpop.f32.mrf.mxu0 }
 0x41e   :  { %v1127_v51 = vpop.f32.mrf.mxu0 }
 0x4c1   :  { %v763_v0 = vpop.f32.mrf.mxu1 }
 0x4c2   :  { %v853_v53 = vadd.f32 %v852_v48, %v763_v0 }
 0x4c3   :  { %v1106_v54 = vpop.f32.mrf.mxu1 }
 0x4c4   :  { %v866_v55 = vadd.f32 %v929_v52, %v853_v53 }
 0x4c5   :  { %v766_v56 = vpop.f32.mrf.mxu1 }
 0x4c6   :  { %868 = vst [vmem:[%s1520_s12] sm:$0xff] %v866_v55  ;;  %v856_v22 = vadd.f32 %v855_v50, %v766_v56 }
 0x4c7   :  { %v1107_v25 = vpop.f32.mrf.mxu1 }
 0x4c8   :  { %v867_v57 = vadd.f32 %v929_v52, %v856_v22 }
 0x4ca   :  { %869 = vst [vmem:[%s1520_s12 + $0x8] sm:$0xff] %v867_v57 }

</bundles_post_ra>
